<compile_context>
chip_gen: v5e
topology: v5e:2x2
jax: 0.10.0
libtpu: 0.0.40
codegen_flags: <defaults>
</compile_context>

<pallas_src>
import jax
import jax.numpy as jnp
import numpy as np
from jax import lax
from jax.experimental import pallas as pl
from jax.experimental.pallas import tpu as pltpu

_H1 = 64        # hidden width of first MLP layer
_H2 = 32        # hidden width of second MLP layer
_OUT = 2        # true output width
_OUT_PAD = 8    # small pad -> single contiguous (masked) store per vreg group


def _round_up(x, m):
    return ((x + m - 1) // m) * m


def _mlp_kernel(pe_ref, disp_ref, w1p_ref, w1d_ref, b1_ref, w2_ref, b2_ref,
                w3_ref, b3_ref, o_ref):
    """One batch tile of the fused MLP.

    pe_ref  : (N, tile_b, 2)   raw point_estimate tile (batch-tiled)
    disp_ref: (N, tile_b)      raw displacements tile
    w1p_ref : (N, 2, H1)       BN-folded W1 rows for point_estimate, per point
    w1d_ref : (N, H1)          BN-folded W1 rows for displacements
    The torch transpose/view/cat is folded into the first contraction:
        h1[b, :] = sum_n pe[n, b, :] @ W1_pe[n] + sum_n disp[n, b] * W1_d[n] + b1
    """
    n_pts = pe_ref.shape[0]

    # Displacement contribution: transposed-LHS matmul (contract over N).
    h = lax.dot_general(
        disp_ref[...].astype(jnp.float32), w1d_ref[...],
        dimension_numbers=(((0,), (0,)), ((), ())),
        preferred_element_type=jnp.float32)                    # (tile_b, H1)
    # Point-estimate contribution: small K=2 matmuls, statically unrolled.
    for n in range(n_pts):
        h += jnp.dot(pe_ref[n].astype(jnp.float32), w1p_ref[n],
                     preferred_element_type=jnp.float32)
    h = jnp.maximum(h + b1_ref[...], 0.0)

    h = jnp.dot(h, w2_ref[...], preferred_element_type=jnp.float32) + b2_ref[...]
    h = jnp.maximum(h, 0.0)

    o_ref[...] = (jnp.dot(h, w3_ref[...], preferred_element_type=jnp.float32)
                  + b3_ref[...])


def init_mlp_aggregator_params(key, number_of_points):
    """PyTorch-style init: Linear U(-1/sqrt(fan_in), ..); BN with running stats."""
    f_in = 3 * number_of_points
    ks = jax.random.split(key, 5)

    def linear(k, fi, fo):
        kw, kb = jax.random.split(k)
        bound = 1.0 / np.sqrt(fi)
        w = jax.random.uniform(kw, (fi, fo), jnp.float32, -bound, bound)
        b = jax.random.uniform(kb, (fo,), jnp.float32, -bound, bound)
        return w, b

    def bn(k, h):
        k1, k2, k3, k4 = jax.random.split(k, 4)
        gamma = 1.0 + 0.1 * jax.random.normal(k1, (h,), jnp.float32)
        beta = 0.1 * jax.random.normal(k2, (h,), jnp.float32)
        mean = 0.1 * jax.random.normal(k3, (h,), jnp.float32)
        var = 0.5 + jnp.abs(jax.random.normal(k4, (h,), jnp.float32))
        return gamma, beta, mean, var

    w1, b1 = linear(ks[0], f_in, _H1)
    w2, b2 = linear(ks[1], _H1, _H2)
    w3, b3 = linear(ks[2], _H2, _OUT)
    return dict(
        w1=w1, b1=b1, bn1=bn(ks[3], _H1),
        w2=w2, b2=b2, bn2=bn(ks[4], _H2),
        w3=w3, b3=b3,
    )


def mlp_aggregate(params, point_estimate, displacements, *, eps=1e-5,
                  batch_tile=2048):
    """Forward pass of MLPAggregator.  Returns (B, 2) float32."""
    point_estimate = jnp.asarray(point_estimate)
    displacements = jnp.asarray(displacements)
    n_pts, batch = point_estimate.shape[0], point_estimate.shape[1]
    displacements = displacements.reshape(n_pts, batch)

    # Fold eval-mode BatchNorm into the preceding Linear.
    def fold(w, b, bn_params):
        g, be, m, v = bn_params
        s = g / jnp.sqrt(v + eps)
        return ((w * s[None, :]).astype(jnp.float32),
                ((b - m) * s + be).astype(jnp.float32))

    w1f, b1f = fold(params["w1"], params["b1"], params["bn1"])
    w2f, b2f = fold(params["w2"], params["b2"], params["bn2"])

    # Split W1: column 2n+c of the torch input is pe[n, b, c]; column 2N+n is
    # disp[n, b].  Group the pe rows by point so the kernel can contract the
    # raw (N, tile_b, 2) / (N, tile_b) blocks directly.
    w1_pe = w1f[: 2 * n_pts].reshape(n_pts, 2, _H1)             # (N, 2, H1)
    w1_disp = w1f[2 * n_pts:]                                   # (N, H1)

    # Pad the last layer to 8 output columns (single contiguous masked store).
    w3p = jnp.zeros((_H2, _OUT_PAD), jnp.float32).at[:, :_OUT].set(params["w3"])
    b3p = jnp.zeros((_OUT_PAD,), jnp.float32).at[:_OUT].set(params["b3"])

    # Batch tiling:
    #  * a tiled (non-full-extent) batch dim must be a multiple of 128 (it is
    #    the minor/lane dim of the displacement block),
    #  * keep >= 2 grid steps when possible so both v7x TensorCores work,
    #  * no padding of inputs/outputs: the ragged final tile relies on Pallas
    #    OOB masking.
    if batch <= 128:
        tile_b = batch                      # single full-extent block
    else:
        tile_b = min(_round_up(min(batch_tile, batch), 128),
                     _round_up(pl.cdiv(batch, 2), 128))
    grid_b = pl.cdiv(batch, tile_b)

    out = pl.pallas_call(
        _mlp_kernel,
        out_shape=jax.ShapeDtypeStruct((batch, _OUT_PAD), jnp.float32),
        grid=(grid_b,),
        in_specs=[
            pl.BlockSpec((n_pts, tile_b, 2), lambda i: (0, i, 0)),   # point_estimate
            pl.BlockSpec((n_pts, tile_b), lambda i: (0, i)),         # displacements
            pl.BlockSpec((n_pts, 2, _H1), lambda i: (0, 0, 0)),      # W1 (pe part)
            pl.BlockSpec((n_pts, _H1), lambda i: (0, 0)),            # W1 (disp part)
            pl.BlockSpec((1, _H1), lambda i: (0, 0)),                # b1 (folded)
            pl.BlockSpec((_H1, _H2), lambda i: (0, 0)),              # W2 (folded)
            pl.BlockSpec((1, _H2), lambda i: (0, 0)),                # b2 (folded)
            pl.BlockSpec((_H2, _OUT_PAD), lambda i: (0, 0)),         # W3 (padded)
            pl.BlockSpec((1, _OUT_PAD), lambda i: (0, 0)),           # b3 (padded)
        ],
        out_specs=pl.BlockSpec((tile_b, _OUT_PAD), lambda i: (i, 0)),
        compiler_params=pltpu.CompilerParams(
            dimension_semantics=("parallel",),
            vmem_limit_bytes=32 * 1024 * 1024),
    )(
        point_estimate, displacements,
        w1_pe, w1_disp, b1f.reshape(1, _H1),
        w2f, b2f.reshape(1, _H2),
        w3p, b3p.reshape(1, _OUT_PAD),
    )
    return out[:, :_OUT]


def _reference(params, point_estimate, displacements, eps=1e-5):
    """Pure-numpy reference (eval-mode BatchNorm, float64 internally)."""
    pe = np.asarray(point_estimate, np.float64)
    disp = np.asarray(displacements, np.float64)
    n_pts, batch = pe.shape[0], pe.shape[1]
    x = np.concatenate(
        [pe.transpose(1, 0, 2).reshape(batch, 2 * n_pts),
         disp.reshape(n_pts, batch).T], axis=-1)

    def bn(h, p):
        g, be, m, v = [np.asarray(t, np.float64) for t in p]
        return (h - m) / np.sqrt(v + eps) * g + be

    h = x @ np.asarray(params["w1"], np.float64) + np.asarray(params["b1"], np.float64)
    h = np.maximum(bn(h, params["bn1"]), 0.0)
    h = h @ np.asarray(params["w2"], np.float64) + np.asarray(params["b2"], np.float64)
    h = np.maximum(bn(h, params["bn2"]), 0.0)
    out = h @ np.asarray(params["w3"], np.float64) + np.asarray(params["b3"], np.float64)
    return out.astype(np.float32)


if __name__ == "__main__":
    key = jax.random.PRNGKey(0)
    k_param, k_pe, k_disp = jax.random.split(key, 3)

    number_of_points, batch_size = 8, 2
    params = init_mlp_aggregator_params(k_param, number_of_points)
    point_estimate = jax.random.normal(
        k_pe, (number_of_points, batch_size, 2), dtype=jnp.float32)
    displacements = jax.random.normal(
        k_disp, (number_of_points, batch_size), dtype=jnp.float32)

    out = mlp_aggregate(params, point_estimate, displacements)
    out = jax.block_until_ready(out)

    ref = _reference(params, point_estimate, displacements)
    np.testing.assert_allclose(np.asarray(out), ref, rtol=1e-4, atol=1e-5)
    print("KERNEL_OK")
</pallas_src>

<mosaic_0001>
module attributes {stable_mosaic.version = 11 : i64} {
  func.func @_mlp_kernel(%arg0: i32, %arg1: memref<8x2x2xf32, #tpu.memory_space<vmem>>, %arg2: memref<8x2xf32, #tpu.memory_space<vmem>>, %arg3: memref<8x2x64xf32, #tpu.memory_space<vmem>>, %arg4: memref<8x64xf32, #tpu.memory_space<vmem>>, %arg5: memref<1x64xf32, #tpu.memory_space<vmem>>, %arg6: memref<64x32xf32, #tpu.memory_space<vmem>>, %arg7: memref<1x32xf32, #tpu.memory_space<vmem>>, %arg8: memref<32x8xf32, #tpu.memory_space<vmem>>, %arg9: memref<1x8xf32, #tpu.memory_space<vmem>>, %arg10: memref<2x8xf32, #tpu.memory_space<vmem>>) attributes {dimension_semantics = [#tpu.dimension_semantics<parallel>], iteration_bounds = array<i64: 1>, scalar_prefetch = 0 : i64, scratch_operands = 0 : i64, tpu.core_type = #tpu.core_type<tc>, window_params = [{transform_indices = @transform_0, window_bounds = array<i64: 8, 2, 2>}, {transform_indices = @transform_1, window_bounds = array<i64: 8, 2>}, {pipeline_mode = #tpu.pipeline_mode<synchronous>, transform_indices = @transform_2, window_bounds = array<i64: 8, 2, 64>}, {pipeline_mode = #tpu.pipeline_mode<synchronous>, transform_indices = @transform_3, window_bounds = array<i64: 8, 64>}, {pipeline_mode = #tpu.pipeline_mode<synchronous>, transform_indices = @transform_4, window_bounds = array<i64: 1, 64>}, {pipeline_mode = #tpu.pipeline_mode<synchronous>, transform_indices = @transform_5, window_bounds = array<i64: 64, 32>}, {pipeline_mode = #tpu.pipeline_mode<synchronous>, transform_indices = @transform_6, window_bounds = array<i64: 1, 32>}, {pipeline_mode = #tpu.pipeline_mode<synchronous>, transform_indices = @transform_7, window_bounds = array<i64: 32, 8>}, {pipeline_mode = #tpu.pipeline_mode<synchronous>, transform_indices = @transform_8, window_bounds = array<i64: 1, 8>}, {transform_indices = @transform_9, window_bounds = array<i64: 2, 8>}]} {
    %c0 = arith.constant 0 : index
    %c0_0 = arith.constant 0 : index
    %0 = vector.load %arg2[%c0, %c0_0] : memref<8x2xf32, #tpu.memory_space<vmem>>, vector<8x2xf32>
    %c0_1 = arith.constant 0 : index
    %c0_2 = arith.constant 0 : index
    %1 = vector.load %arg4[%c0_1, %c0_2] : memref<8x64xf32, #tpu.memory_space<vmem>>, vector<8x64xf32>
    %cst = arith.constant dense<0.000000e+00> : vector<2x64xf32>
    %2 = tpu.matmul %0, %1, %cst {dimension_numbers = #tpu.dot_dimension_numbers<[0], [0], [1], [1], [0, 1, 1, 1], [], []>} : vector<8x2xf32>, vector<8x64xf32>, vector<2x64xf32> -> vector<2x64xf32>
    %c0_3 = arith.constant 0 : index
    %c0_4 = arith.constant 0 : index
    %c0_5 = arith.constant 0 : index
    %3 = vector.load %arg1[%c0_3, %c0_4, %c0_5] : memref<8x2x2xf32, #tpu.memory_space<vmem>>, vector<1x2x2xf32>
    %4 = vector.shape_cast %3 : vector<1x2x2xf32> to vector<2x2xf32>
    %c0_6 = arith.constant 0 : index
    %c0_7 = arith.constant 0 : index
    %c0_8 = arith.constant 0 : index
    %5 = vector.load %arg3[%c0_6, %c0_7, %c0_8] : memref<8x2x64xf32, #tpu.memory_space<vmem>>, vector<1x2x64xf32>
    %6 = vector.shape_cast %5 : vector<1x2x64xf32> to vector<2x64xf32>
    %cst_9 = arith.constant dense<0.000000e+00> : vector<2x64xf32>
    %7 = tpu.matmul %4, %6, %cst_9 {dimension_numbers = #tpu.dot_dimension_numbers<[1], [0], [0], [1], [0, 0, 1, 1], [], []>} : vector<2x2xf32>, vector<2x64xf32>, vector<2x64xf32> -> vector<2x64xf32>
    %8 = arith.addf %2, %7 : vector<2x64xf32>
    %c1 = arith.constant 1 : index
    %c0_10 = arith.constant 0 : index
    %c0_11 = arith.constant 0 : index
    %9 = vector.load %arg1[%c1, %c0_10, %c0_11] : memref<8x2x2xf32, #tpu.memory_space<vmem>>, vector<1x2x2xf32>
    %10 = vector.shape_cast %9 : vector<1x2x2xf32> to vector<2x2xf32>
    %c1_12 = arith.constant 1 : index
    %c0_13 = arith.constant 0 : index
    %c0_14 = arith.constant 0 : index
    %11 = vector.load %arg3[%c1_12, %c0_13, %c0_14] : memref<8x2x64xf32, #tpu.memory_space<vmem>>, vector<1x2x64xf32>
    %12 = vector.shape_cast %11 : vector<1x2x64xf32> to vector<2x64xf32>
    %cst_15 = arith.constant dense<0.000000e+00> : vector<2x64xf32>
    %13 = tpu.matmul %10, %12, %cst_15 {dimension_numbers = #tpu.dot_dimension_numbers<[1], [0], [0], [1], [0, 0, 1, 1], [], []>} : vector<2x2xf32>, vector<2x64xf32>, vector<2x64xf32> -> vector<2x64xf32>
    %14 = arith.addf %8, %13 : vector<2x64xf32>
    %c2 = arith.constant 2 : index
    %c0_16 = arith.constant 0 : index
    %c0_17 = arith.constant 0 : index
    %15 = vector.load %arg1[%c2, %c0_16, %c0_17] : memref<8x2x2xf32, #tpu.memory_space<vmem>>, vector<1x2x2xf32>
    %16 = vector.shape_cast %15 : vector<1x2x2xf32> to vector<2x2xf32>
    %c2_18 = arith.constant 2 : index
    %c0_19 = arith.constant 0 : index
    %c0_20 = arith.constant 0 : index
    %17 = vector.load %arg3[%c2_18, %c0_19, %c0_20] : memref<8x2x64xf32, #tpu.memory_space<vmem>>, vector<1x2x64xf32>
    %18 = vector.shape_cast %17 : vector<1x2x64xf32> to vector<2x64xf32>
    %cst_21 = arith.constant dense<0.000000e+00> : vector<2x64xf32>
    %19 = tpu.matmul %16, %18, %cst_21 {dimension_numbers = #tpu.dot_dimension_numbers<[1], [0], [0], [1], [0, 0, 1, 1], [], []>} : vector<2x2xf32>, vector<2x64xf32>, vector<2x64xf32> -> vector<2x64xf32>
    %20 = arith.addf %14, %19 : vector<2x64xf32>
    %c3 = arith.constant 3 : index
    %c0_22 = arith.constant 0 : index
    %c0_23 = arith.constant 0 : index
    %21 = vector.load %arg1[%c3, %c0_22, %c0_23] : memref<8x2x2xf32, #tpu.memory_space<vmem>>, vector<1x2x2xf32>
    %22 = vector.shape_cast %21 : vector<1x2x2xf32> to vector<2x2xf32>
    %c3_24 = arith.constant 3 : index
    %c0_25 = arith.constant 0 : index
    %c0_26 = arith.constant 0 : index
    %23 = vector.load %arg3[%c3_24, %c0_25, %c0_26] : memref<8x2x64xf32, #tpu.memory_space<vmem>>, vector<1x2x64xf32>
    %24 = vector.shape_cast %23 : vector<1x2x64xf32> to vector<2x64xf32>
    %cst_27 = arith.constant dense<0.000000e+00> : vector<2x64xf32>
    %25 = tpu.matmul %22, %24, %cst_27 {dimension_numbers = #tpu.dot_dimension_numbers<[1], [0], [0], [1], [0, 0, 1, 1], [], []>} : vector<2x2xf32>, vector<2x64xf32>, vector<2x64xf32> -> vector<2x64xf32>
    %26 = arith.addf %20, %25 : vector<2x64xf32>
    %c4 = arith.constant 4 : index
    %c0_28 = arith.constant 0 : index
    %c0_29 = arith.constant 0 : index
    %27 = vector.load %arg1[%c4, %c0_28, %c0_29] : memref<8x2x2xf32, #tpu.memory_space<vmem>>, vector<1x2x2xf32>
    %28 = vector.shape_cast %27 : vector<1x2x2xf32> to vector<2x2xf32>
    %c4_30 = arith.constant 4 : index
    %c0_31 = arith.constant 0 : index
    %c0_32 = arith.constant 0 : index
    %29 = vector.load %arg3[%c4_30, %c0_31, %c0_32] : memref<8x2x64xf32, #tpu.memory_space<vmem>>, vector<1x2x64xf32>
    %30 = vector.shape_cast %29 : vector<1x2x64xf32> to vector<2x64xf32>
    %cst_33 = arith.constant dense<0.000000e+00> : vector<2x64xf32>
    %31 = tpu.matmul %28, %30, %cst_33 {dimension_numbers = #tpu.dot_dimension_numbers<[1], [0], [0], [1], [0, 0, 1, 1], [], []>} : vector<2x2xf32>, vector<2x64xf32>, vector<2x64xf32> -> vector<2x64xf32>
    %32 = arith.addf %26, %31 : vector<2x64xf32>
    %c5 = arith.constant 5 : index
    %c0_34 = arith.constant 0 : index
    %c0_35 = arith.constant 0 : index
    %33 = vector.load %arg1[%c5, %c0_34, %c0_35] : memref<8x2x2xf32, #tpu.memory_space<vmem>>, vector<1x2x2xf32>
    %34 = vector.shape_cast %33 : vector<1x2x2xf32> to vector<2x2xf32>
    %c5_36 = arith.constant 5 : index
    %c0_37 = arith.constant 0 : index
    %c0_38 = arith.constant 0 : index
    %35 = vector.load %arg3[%c5_36, %c0_37, %c0_38] : memref<8x2x64xf32, #tpu.memory_space<vmem>>, vector<1x2x64xf32>
    %36 = vector.shape_cast %35 : vector<1x2x64xf32> to vector<2x64xf32>
    %cst_39 = arith.constant dense<0.000000e+00> : vector<2x64xf32>
    %37 = tpu.matmul %34, %36, %cst_39 {dimension_numbers = #tpu.dot_dimension_numbers<[1], [0], [0], [1], [0, 0, 1, 1], [], []>} : vector<2x2xf32>, vector<2x64xf32>, vector<2x64xf32> -> vector<2x64xf32>
    %38 = arith.addf %32, %37 : vector<2x64xf32>
    %c6 = arith.constant 6 : index
    %c0_40 = arith.constant 0 : index
    %c0_41 = arith.constant 0 : index
    %39 = vector.load %arg1[%c6, %c0_40, %c0_41] : memref<8x2x2xf32, #tpu.memory_space<vmem>>, vector<1x2x2xf32>
    %40 = vector.shape_cast %39 : vector<1x2x2xf32> to vector<2x2xf32>
    %c6_42 = arith.constant 6 : index
    %c0_43 = arith.constant 0 : index
    %c0_44 = arith.constant 0 : index
    %41 = vector.load %arg3[%c6_42, %c0_43, %c0_44] : memref<8x2x64xf32, #tpu.memory_space<vmem>>, vector<1x2x64xf32>
    %42 = vector.shape_cast %41 : vector<1x2x64xf32> to vector<2x64xf32>
    %cst_45 = arith.constant dense<0.000000e+00> : vector<2x64xf32>
    %43 = tpu.matmul %40, %42, %cst_45 {dimension_numbers = #tpu.dot_dimension_numbers<[1], [0], [0], [1], [0, 0, 1, 1], [], []>} : vector<2x2xf32>, vector<2x64xf32>, vector<2x64xf32> -> vector<2x64xf32>
    %44 = arith.addf %38, %43 : vector<2x64xf32>
    %c7 = arith.constant 7 : index
    %c0_46 = arith.constant 0 : index
    %c0_47 = arith.constant 0 : index
    %45 = vector.load %arg1[%c7, %c0_46, %c0_47] : memref<8x2x2xf32, #tpu.memory_space<vmem>>, vector<1x2x2xf32>
    %46 = vector.shape_cast %45 : vector<1x2x2xf32> to vector<2x2xf32>
    %c7_48 = arith.constant 7 : index
    %c0_49 = arith.constant 0 : index
    %c0_50 = arith.constant 0 : index
    %47 = vector.load %arg3[%c7_48, %c0_49, %c0_50] : memref<8x2x64xf32, #tpu.memory_space<vmem>>, vector<1x2x64xf32>
    %48 = vector.shape_cast %47 : vector<1x2x64xf32> to vector<2x64xf32>
    %cst_51 = arith.constant dense<0.000000e+00> : vector<2x64xf32>
    %49 = tpu.matmul %46, %48, %cst_51 {dimension_numbers = #tpu.dot_dimension_numbers<[1], [0], [0], [1], [0, 0, 1, 1], [], []>} : vector<2x2xf32>, vector<2x64xf32>, vector<2x64xf32> -> vector<2x64xf32>
    %50 = arith.addf %44, %49 : vector<2x64xf32>
    %c0_52 = arith.constant 0 : index
    %c0_53 = arith.constant 0 : index
    %51 = vector.load %arg5[%c0_52, %c0_53] : memref<1x64xf32, #tpu.memory_space<vmem>>, vector<1x64xf32>
    %52 = vector.broadcast %51 : vector<1x64xf32> to vector<2x64xf32>
    %53 = arith.addf %50, %52 : vector<2x64xf32>
    %cst_54 = arith.constant 0.000000e+00 : f32
    %54 = vector.broadcast %cst_54 : f32 to vector<2x64xf32>
    %55 = arith.maximumf %53, %54 : vector<2x64xf32>
    %c0_55 = arith.constant 0 : index
    %c0_56 = arith.constant 0 : index
    %56 = vector.load %arg6[%c0_55, %c0_56] : memref<64x32xf32, #tpu.memory_space<vmem>>, vector<64x32xf32>
    %cst_57 = arith.constant dense<0.000000e+00> : vector<2x32xf32>
    %57 = tpu.matmul %55, %56, %cst_57 {dimension_numbers = #tpu.dot_dimension_numbers<[1], [0], [0], [1], [0, 0, 1, 1], [], []>} : vector<2x64xf32>, vector<64x32xf32>, vector<2x32xf32> -> vector<2x32xf32>
    %c0_58 = arith.constant 0 : index
    %c0_59 = arith.constant 0 : index
    %58 = vector.load %arg7[%c0_58, %c0_59] : memref<1x32xf32, #tpu.memory_space<vmem>>, vector<1x32xf32>
    %59 = vector.broadcast %58 : vector<1x32xf32> to vector<2x32xf32>
    %60 = arith.addf %57, %59 : vector<2x32xf32>
    %cst_60 = arith.constant 0.000000e+00 : f32
    %61 = vector.broadcast %cst_60 : f32 to vector<2x32xf32>
    %62 = arith.maximumf %60, %61 : vector<2x32xf32>
    %c0_61 = arith.constant 0 : index
    %c0_62 = arith.constant 0 : index
    %63 = vector.load %arg8[%c0_61, %c0_62] : memref<32x8xf32, #tpu.memory_space<vmem>>, vector<32x8xf32>
    %cst_63 = arith.constant dense<0.000000e+00> : vector<2x8xf32>
    %64 = tpu.matmul %62, %63, %cst_63 {dimension_numbers = #tpu.dot_dimension_numbers<[1], [0], [0], [1], [0, 0, 1, 1], [], []>} : vector<2x32xf32>, vector<32x8xf32>, vector<2x8xf32> -> vector<2x8xf32>
    %c0_64 = arith.constant 0 : index
    %c0_65 = arith.constant 0 : index
    %65 = vector.load %arg9[%c0_64, %c0_65] : memref<1x8xf32, #tpu.memory_space<vmem>>, vector<1x8xf32>
    %66 = vector.broadcast %65 : vector<1x8xf32> to vector<2x8xf32>
    %67 = arith.addf %64, %66 : vector<2x8xf32>
    %c0_66 = arith.constant 0 : index
    %c0_67 = arith.constant 0 : index
    %68 = vector.load %arg10[%c0_66, %c0_67] : memref<2x8xf32, #tpu.memory_space<vmem>>, vector<2x8xf32>
    tpu.vector_store %arg10[%c0_66, %c0_67], %67 {strides = array<i32>} : memref<2x8xf32, #tpu.memory_space<vmem>>, vector<2x8xf32>,
    return
  }
  func.func @transform_0(%arg0: i32) -> (i32, i32, i32) {
    %c0_i32 = arith.constant 0 : i32
    %c0_i32_0 = arith.constant 0 : i32
    %c0_i32_1 = arith.constant 0 : i32
    return %c0_i32, %arg0, %c0_i32_0 : i32, i32, i32
  }
  func.func @transform_1(%arg0: i32) -> (i32, i32) {
    %c0_i32 = arith.constant 0 : i32
    %c0_i32_0 = arith.constant 0 : i32
    return %c0_i32, %arg0 : i32, i32
  }
  func.func @transform_2(%arg0: i32) -> (i32, i32, i32) {
    %c0_i32 = arith.constant 0 : i32
    %c0_i32_0 = arith.constant 0 : i32
    %c0_i32_1 = arith.constant 0 : i32
    %c0_i32_2 = arith.constant 0 : i32
    return %c0_i32, %c0_i32_0, %c0_i32_1 : i32, i32, i32
  }
  func.func @transform_3(%arg0: i32) -> (i32, i32) {
    %c0_i32 = arith.constant 0 : i32
    %c0_i32_0 = arith.constant 0 : i32
    %c0_i32_1 = arith.constant 0 : i32
    return %c0_i32, %c0_i32_0 : i32, i32
  }
  func.func @transform_4(%arg0: i32) -> (i32, i32) {
    %c0_i32 = arith.constant 0 : i32
    %c0_i32_0 = arith.constant 0 : i32
    %c0_i32_1 = arith.constant 0 : i32
    return %c0_i32, %c0_i32_0 : i32, i32
  }
  func.func @transform_5(%arg0: i32) -> (i32, i32) {
    %c0_i32 = arith.constant 0 : i32
    %c0_i32_0 = arith.constant 0 : i32
    %c0_i32_1 = arith.constant 0 : i32
    return %c0_i32, %c0_i32_0 : i32, i32
  }
  func.func @transform_6(%arg0: i32) -> (i32, i32) {
    %c0_i32 = arith.constant 0 : i32
    %c0_i32_0 = arith.constant 0 : i32
    %c0_i32_1 = arith.constant 0 : i32
    return %c0_i32, %c0_i32_0 : i32, i32
  }
  func.func @transform_7(%arg0: i32) -> (i32, i32) {
    %c0_i32 = arith.constant 0 : i32
    %c0_i32_0 = arith.constant 0 : i32
    %c0_i32_1 = arith.constant 0 : i32
    return %c0_i32, %c0_i32_0 : i32, i32
  }
  func.func @transform_8(%arg0: i32) -> (i32, i32) {
    %c0_i32 = arith.constant 0 : i32
    %c0_i32_0 = arith.constant 0 : i32
    %c0_i32_1 = arith.constant 0 : i32
    return %c0_i32, %c0_i32_0 : i32, i32
  }
  func.func @transform_9(%arg0: i32) -> (i32, i32) {
    %c0_i32 = arith.constant 0 : i32
    %c0_i32_0 = arith.constant 0 : i32
    return %arg0, %c0_i32 : i32, i32
  }
}

</mosaic_0001>

<bundles_post_ra>
// kernel: tpu_custom_call.1
= control target key start
LH: loop header
LB: loop body
LE: loop exit
PB: predicated region body
PF: predicated region fallthrough
CT: control target
= control target key end

     0   :  { %s664_s0 = inlined_call_operand.vmem [shape: f32[8,2,2], index: 0, kind: input, shape index: {}]   ;;  %s665_s1 = inlined_call_operand.vmem [shape: f32[8,2], index: 1, kind: input, shape index: {}]   ;;  %s666_s2 = inlined_call_operand.vmem [shape: f32[8,2,64], index: 2, kind: input, shape index: {}]   ;;  %s667_s3 = inlined_call_operand.vmem [shape: f32[8,64], index: 3, kind: input, shape index: {}]   ;;  %s668_s4 = inlined_call_operand.vmem [shape: f32[1,64], index: 4, kind: input, shape index: {}]   ;;  %s669_s5 = inlined_call_operand.vmem [shape: f32[64,32], index: 5, kind: input, shape index: {}]   ;;  %s670_s6 = inlined_call_operand.vmem [shape: f32[1,32], index: 6, kind: input, shape index: {}]   ;;  %s671_s7 = inlined_call_operand.vmem [shape: f32[32,8], index: 7, kind: input, shape index: {}]   ;;  %s672_s8 = inlined_call_operand.vmem [shape: f32[1,8], index: 8, kind: input, shape index: {}]   ;;  %s673_s9 = inlined_call_operand.hbm [shape: f32[2,8], index: 9, kind: output, shape index: {}]  }
   0x1   :  { %v33_v0 = vld [vmem:[%s665_s1] sm:$0xff] }
   0x2   :  { %v34_v1 = vld [vmem:[%s667_s3] sm:$0xff]  ;;  %65 = vxpose.xlu0.b32.start.end [1/1] (short) (narrow) %v33_v0, 8 }
   0x3   :  { %116 = vmatpush.msra.mxu3 %v34_v1 }
   0x4   :  { %14 = vsyncpa [#allocation3], 0  ;;  %vm41_vm0 = vcmask 1041408   ;;  %v439_v2 = vld [vmem:[%s666_s2 + $0x4] sm:$0x3]  ;;  %vm37_vm1 = vcmask 15360  }
   0x5   :  { %v435_v3 = vld [vmem:[%s666_s2 + $0x2] sm:$0x3]  ;;  %440 = vmatpush.msk.msrb.mxu3 %vm41_vm0, %v439_v2  ;;  %v36_v5 = vld [vmem:[%s666_s2] sm:$0x3]  ;;  %v451_v7 = vld [vmem:[%s666_s2 + $0xa] sm:$0x3] }
   0x6   :  { %436 = vmatpush.msk.msra.mxu2 %vm41_vm0, %v435_v3  ;;  %v434_v4 = vld [vmem:[%s664_s0 + $0x2] sm:$0x3]  ;;  %v35_v6 = vld [vmem:[%s664_s0] sm:$0x3]  ;;  %431 = vmatpush.msk.msra.mxu0 %vm41_vm0, %v36_v5  ;;  %v443_v8 = vld [vmem:[%s666_s2 + $0x6] sm:$0x3] }
   0x7   :  { %437 = vmatmul.msk.f32.vlgmr.msra.gmra.mxu2 %vm37_vm1, %v434_v4  ;;  %432 = vmatmul.msk.f32.vlgmr.msra.gmra.mxu0 %vm37_vm1, %v35_v6  ;;  %v450_v9 = vld [vmem:[%s664_s0 + $0xa] sm:$0x3]  ;;  %v442_v10 = vld [vmem:[%s664_s0 + $0x6] sm:$0x3]  ;;  %v459_v11 = vld [vmem:[%s666_s2 + $0xe] sm:$0x3] }
   0x8   :  { %452 = vmatpush.msk.msrb.mxu2 %vm41_vm0, %v451_v7  ;;  %444 = vmatpush.msk.msrb.mxu0 %vm41_vm0, %v443_v8  ;;  %v447_v12 = vld [vmem:[%s666_s2 + $0x8] sm:$0x3]  ;;  %v458_v14 = vld [vmem:[%s664_s0 + $0xe] sm:$0x3]  ;;  %vm97_vm2 = vcmask 64512   ;;  %v351_v19 = vld [vmem:[%s669_s5 + $0x38] sm:$0xff] }
   0x9   :  { %v446_v13 = vld [vmem:[%s664_s0 + $0x8] sm:$0x3]  ;;  %448 = vmatpush.msk.msra.mxu1 %vm41_vm0, %v447_v12  ;;  %v455_v15 = vld [vmem:[%s666_s2 + $0xc] sm:$0x3]  ;;  %v438_v17 = vld [vmem:[%s664_s0 + $0x4] sm:$0x3] }
   0xa   :  { %460 = vmatpush.msk.msra.mxu0 %vm41_vm0, %v459_v11  ;;  %449 = vmatmul.msk.f32.vlgmr.msra.gmra.mxu1 %vm37_vm1, %v446_v13  ;;  %v454_v18 = vld [vmem:[%s664_s0 + $0xc] sm:$0x3]  ;;  %v350_v20 = vld [vmem:[%s669_s5 + $0x30] sm:$0xff]  ;;  %v348_v22 = vld [vmem:[%s669_s5 + $0x20] sm:$0xff]  ;;  %vm356_vm3 = vcmask 523264   ;;  %vm389_vm4 = vcmask 261120  }
   0xb   :  { %368 = vmatpush.msrb.mxu1 %v351_v19  ;;  %v349_v21 = vld [vmem:[%s669_s5 + $0x28] sm:$0xff]  ;;  %v347_v23 = vld [vmem:[%s669_s5 + $0x18] sm:$0xff]  ;;  %v346_v24 = vld [vmem:[%s669_s5 + $0x10] sm:$0xff]  ;;  %s495_s22 = smov [#allocation2]   ;;  %vm413_vm5 = vcmask 58368  }
   0xc   :  { %v345_v25 = vld [vmem:[%s669_s5 + $0x8] sm:$0xff]  ;;  %v344_v26 = vld [vmem:[%s669_s5] sm:$0xff]  ;;  %v384_v27 = vld [vmem:[%s671_s7 + $0x18] sm:$0xff]  ;;  %s420_s23 = sshll.u32 %s495_s22, 4  ;;  %s421_s23 = int_to_ptr.vmem [resolvable:$true] %s420_s23 }
   0xd   :  { %369 = vmatpush.msrb.mxu1 %v350_v20  ;;  %v383_v28 = vld [vmem:[%s671_s7 + $0x10] sm:$0xff]  ;;  %405 = vmatpush.msra.mxu2 %v384_v27  ;;  %v466_v45 = vld [vmem:[%s668_s4] ss:$0 sm:$0xff]  ;;  %v382_v49 = vld [vmem:[%s671_s7 + $0x8] sm:$0xff] }
   0xe   :  { %v381_v50 = vld [vmem:[%s671_s7] sm:$0xff]  ;;  %s422_s7 = sshll.u32 %s673_s9, 4  ;;  %s423_s7 = int_to_ptr.hbm [resolvable:$true] %s422_s7 }
   0xf   :  { %453 = vmatmul.msk.f32.vlgmr.msrb.gmra.mxu2 %vm37_vm1, %v450_v9  ;;  %445 = vmatmul.msk.f32.vlgmr.msrb.gmra.mxu0 %vm37_vm1, %v442_v10  ;;  %v467_v51 = vld [vmem:[%s670_s6] ss:$0 sm:$0xff] }
  0x10   :  { %370 = vmatpush.msrb.mxu1 %v349_v21  ;;  %406 = vmatpush.msra.mxu2 %v383_v28  ;;  %v468_v55 = vld [vmem:[%s672_s8] ss:$0 sm:$0xff] }
  0x12   :  { %371 = vmatpush.msrb.mxu1 %v348_v22  ;;  %407 = vmatpush.msra.mxu2 %v382_v49 }
  0x14   :  { %372 = vmatpush.msrb.mxu1 %v347_v23  ;;  %408 = vmatpush.msra.mxu2 %v381_v50 }
  0x16   :  { %373 = vmatpush.msrb.mxu1 %v346_v24 }
  0x17   :  { %461 = vmatmul.msk.f32.vlgmr.msra.gmra.mxu0 %vm37_vm1, %v458_v14 }
  0x18   :  { %374 = vmatpush.msrb.mxu1 %v345_v25 }
  0x1a   :  { %375 = vmatpush.msrb.mxu1 %v344_v26 }
  0x84   :  { %v62_v29 = vpop.f32.mrf.mxu0 }
  0x87   :  { %v241_v37 = vpop.f32.mrf.mxu1 }
  0x8a   :  { %v148_v32 = vpop.f32.mrf.mxu2 }
  0x8c   :  { %v210_v33 = vpop.f32.mrf.mxu0 }
  0x92   :  { %v272_v39 = vpop.f32.mrf.mxu2 }
  0x94   :  { %v334_v43 = vpop.f32.mrf.mxu0 }
  0xa6   :  { %v81_v16 = vpop.trf.xlu0 }
  0xa7   :  { %433 = vmatmul.msk.f32.vlgmr.msra.gmra.mxu3 %vm97_vm2, %v81_v16 }
  0xa8   :  { %456 = vmatpush.msk.msra.mxu3 %vm41_vm0, %v455_v15 }
  0xaf   :  { %441 = vmatmul.msk.f32.vlgmr.msrb.gmra.mxu3 %vm37_vm1, %v438_v17 }
  0xb7   :  { %457 = vmatmul.msk.f32.vlgmr.msra.gmra.mxu3 %vm37_vm1, %v454_v18 }
 0x12a   :  { %v118_v30 = vpop.f32.mrf.mxu3 }
 0x12b   :  { %v119_v31 = vadd.f32 %v118_v30, %v62_v29 }
 0x12d   :  { %v151_v34 = vadd.f32 %v148_v32, %v119_v31 }
 0x132   :  { %v179_v35 = vpop.f32.mrf.mxu3 }
 0x133   :  { %v182_v36 = vadd.f32 %v179_v35, %v151_v34 }
 0x135   :  { %v213_v38 = vadd.f32 %v210_v33, %v182_v36 }
 0x137   :  { %v244_v40 = vadd.f32 %v241_v37, %v213_v38 }
 0x139   :  { %v275_v41 = vadd.f32 %v272_v39, %v244_v40 }
 0x13a   :  { %v303_v42 = vpop.f32.mrf.mxu3 }
 0x13b   :  { %v306_v44 = vadd.f32 %v303_v42, %v275_v41 }
 0x13d   :  { %v337_v46 = vadd.f32 %v334_v43, %v306_v44 }
 0x13f   :  { %v342_v47 = vadd.f32 %v466_v45, %v337_v46 }
 0x141   :  { %v343_v48 = vmax.f32 %v342_v47, 0.0 }
 0x143   :  { %462 = vmatmul.msk.f32.vlgmr.msrb.gmra.mxu1 %vm356_vm3, %v343_v48 }
 0x1c0   :  { %v377_v52 = vpop.f32.mrf.mxu1 }
 0x1c1   :  { %v378_v53 = vadd.f32 %v467_v51, %v377_v52 }
 0x1c3   :  { %v380_v54 = vmax.f32 %v378_v53, 0.0 }
 0x1c5   :  { %463 = vmatmul.msk.f32.vlgmr.msra.gmra.mxu2 %vm389_vm4, %v380_v54 }
 0x248   :  { %v410_v56 = vpop.f32.mrf.mxu2 }
 0x249   :  { %v411_v57 = vadd.f32 %v468_v55, %v410_v56 }
 0x24b   :  { %414 = vst.msk [vmem:[#allocation2] sm:$0x3] %vm413_vm5, %v411_v57 }
 0x24c   :  { %425 = dma.vmem_to_hbm [thread:$0]  %s421_s23, 32, %s423_s7, [#allocation3]  }
 0x24d   :  { %493 = dma.done.wait [#allocation3], 32  }
 0x24e   :  { %494 = vsyncadd [#allocation3], 4294967264 }
 0x24f   :  { %430 = vsyncpa [#allocation3], 1 }

</bundles_post_ra>
